<compile_context>
chip_gen: v6e
topology: v6e:2x2x1
jax: 0.10.0
libtpu: 0.0.40
codegen_flags: <defaults>
</compile_context>

<pallas_src>
import math

import jax
import jax.numpy as jnp
from jax.experimental import pallas as pl
from jax.experimental.pallas import tpu as pltpu

# ---------------- model hyperparameters (small, synthetic) ----------------
B = 2          # batch
S = 8          # sequence length
D_MODEL = 32   # d_model
NUM_HEADS = 4
D_HEAD = D_MODEL // NUM_HEADS
DIM_FF = 64
LN_EPS = 1e-5

_W_COLS = 3 * D_MODEL            # packed weight slab lane width (96)


def _layernorm(x, gamma, beta):
    # x: (N, D); gamma, beta: (1, D)
    mu = jnp.mean(x, axis=-1, keepdims=True)
    xc = x - mu
    var = jnp.mean(xc * xc, axis=-1, keepdims=True)
    return xc * jax.lax.rsqrt(var + LN_EPS) * gamma + beta


def encoder_block_kernel(x_ref, w_ref, vec_ref, out_ref):
    x = x_ref[...]                                   # (B*S, D) fp32 residual stream

    # ---- unpack parameter slabs (static ref slices) -----------------------
    # NOTE: sublane-broadcast reads (pl.ds(row, B*S, stride=0)) for the LN
    # vectors / biases were considered and skipped: at 16 rows the implicit
    # broadcasts are a handful of ops and the plain slices are more portable.
    ln1_g = vec_ref[0:1, :D_MODEL]
    ln1_b = vec_ref[1:2, :D_MODEL]
    b_qkv = vec_ref[2:3, :]                          # fused QKV bias (1, 3D)
    bo    = vec_ref[3:4, :D_MODEL]
    ln2_g = vec_ref[4:5, :D_MODEL]
    ln2_b = vec_ref[5:6, :D_MODEL]
    b1    = vec_ref[6:7, :DIM_FF]
    b2    = vec_ref[7:8, :D_MODEL]

    w_qkv = w_ref[0:D_MODEL, :]                                   # (D, 3D)
    wo    = w_ref[D_MODEL:2 * D_MODEL, :D_MODEL]                  # (D, D)
    w1    = w_ref[2 * D_MODEL:3 * D_MODEL, :DIM_FF]               # (D, FF)
    w2    = w_ref[3 * D_MODEL:3 * D_MODEL + DIM_FF, :D_MODEL]     # (FF, D)

    # ---- norm1 + fused QKV projection --------------------------------------
    xn = _layernorm(x, ln1_g, ln1_b)
    qkv = jnp.dot(xn, w_qkv, preferred_element_type=jnp.float32) + b_qkv   # (B*S, 3D)

    def split_heads(t):      # (B*S, D) -> (B*H, S, D_HEAD), one relayout per tensor
        return (t.reshape(B, S, NUM_HEADS, D_HEAD)
                 .transpose(0, 2, 1, 3)
                 .reshape(B * NUM_HEADS, S, D_HEAD))

    qh = split_heads(qkv[:, 0:D_MODEL])
    kh = split_heads(qkv[:, D_MODEL:2 * D_MODEL])
    vh = split_heads(qkv[:, 2 * D_MODEL:3 * D_MODEL])

    # ---- multi-head self-attention, all (batch, head) pairs batched --------
    scale = 1.0 / math.sqrt(D_HEAD)
    s = jnp.einsum("nqd,nkd->nqk", qh, kh,
                   preferred_element_type=jnp.float32) * scale        # (B*H, S, S)
    s = s - jnp.max(s, axis=-1, keepdims=True)                        # stable softmax
    p = jnp.exp(s)
    p = p / jnp.sum(p, axis=-1, keepdims=True)                        # exact divide
    o = jnp.einsum("nqk,nkd->nqd", p, vh,
                   preferred_element_type=jnp.float32)                # (B*H, S, D_HEAD)

    # merge heads: (B*H, S, Dh) -> (B*S, D) with one relayout
    attn = (o.reshape(B, NUM_HEADS, S, D_HEAD)
              .transpose(0, 2, 1, 3)
              .reshape(B * S, D_MODEL))

    attn_out = jnp.dot(attn, wo, preferred_element_type=jnp.float32) + bo
    # TODO(synk): dropout1/dropout2 are identity (inference); training-mode
    # dropout would need pltpu.prng_* masks.
    x = x + attn_out                                  # residual 1

    # ---- norm2 + feed-forward ----------------------------------------------
    xn2 = _layernorm(x, ln2_g, ln2_b)
    h1 = jnp.dot(xn2, w1, preferred_element_type=jnp.float32) + b1
    h1 = jnp.maximum(h1, 0.0)                         # ReLU
    ffn = jnp.dot(h1, w2, preferred_element_type=jnp.float32) + b2

    out_ref[...] = x + ffn                            # residual 2


def pack_params(params):
    """Pack the 16 raw parameter arrays into 2 slabs.

    Called ONCE at init (outside the jitted per-call path) so the concat/pad
    ops and the extra HBM round-trip never appear on the hot path.
    """
    (ln1g, ln1b, wq, bq, wk, bk, wv, bv, wo, bo,
     ln2g, ln2b, w1, b1, w2, b2) = params

    def pad_lanes(a):
        return jnp.pad(a, ((0, 0), (0, _W_COLS - a.shape[-1])))

    w_all = jnp.concatenate(
        [jnp.concatenate([wq, wk, wv], axis=-1),      # fused QKV weight (D, 3D)
         pad_lanes(wo), pad_lanes(w1), pad_lanes(w2)],
        axis=0)                                       # (3D + FF, 3D) = (160, 96)

    vecs = jnp.concatenate(
        [pad_lanes(ln1g), pad_lanes(ln1b),
         jnp.concatenate([bq, bk, bv], axis=-1),      # fused QKV bias (1, 3D)
         pad_lanes(bo), pad_lanes(ln2g), pad_lanes(ln2b),
         pad_lanes(b1), pad_lanes(b2)],
        axis=0)                                       # (8, 96)

    return jax.device_put(w_all), jax.device_put(vecs)


@jax.jit
def transformer_encoder_block(x, w_all, vecs):
    """x: (B, S, D_MODEL) float32; w_all/vecs: pre-packed slabs."""
    x2d = x.reshape(B * S, D_MODEL)

    out2d = pl.pallas_call(
        encoder_block_kernel,
        out_shape=jax.ShapeDtypeStruct((B * S, D_MODEL), jnp.float32),
        # Single invocation (no grid): every operand lives fully in VMEM.
        in_specs=[
            pl.BlockSpec(memory_space=pltpu.MemorySpace.VMEM),   # x     (16, 32)
            pl.BlockSpec(memory_space=pltpu.MemorySpace.VMEM),   # w_all (160, 96)
            pl.BlockSpec(memory_space=pltpu.MemorySpace.VMEM),   # vecs  (8, 96)
        ],
        out_specs=pl.BlockSpec(memory_space=pltpu.MemorySpace.VMEM),
    )(x2d, w_all, vecs)

    return out2d.reshape(B, S, D_MODEL)


def init_params(key):
    ks = jax.random.split(key, 8)
    scale_d = 1.0 / math.sqrt(D_MODEL)
    scale_ff = 1.0 / math.sqrt(DIM_FF)
    params = [
        jnp.ones((1, D_MODEL), jnp.float32),                                   # ln1 gamma
        jnp.zeros((1, D_MODEL), jnp.float32),                                  # ln1 beta
        jax.random.normal(ks[0], (D_MODEL, D_MODEL), jnp.float32) * scale_d,   # Wq
        jnp.zeros((1, D_MODEL), jnp.float32),                                  # bq
        jax.random.normal(ks[1], (D_MODEL, D_MODEL), jnp.float32) * scale_d,   # Wk
        jnp.zeros((1, D_MODEL), jnp.float32),                                  # bk
        jax.random.normal(ks[2], (D_MODEL, D_MODEL), jnp.float32) * scale_d,   # Wv
        jnp.zeros((1, D_MODEL), jnp.float32),                                  # bv
        jax.random.normal(ks[3], (D_MODEL, D_MODEL), jnp.float32) * scale_d,   # Wo
        jnp.zeros((1, D_MODEL), jnp.float32),                                  # bo
        jnp.ones((1, D_MODEL), jnp.float32),                                   # ln2 gamma
        jnp.zeros((1, D_MODEL), jnp.float32),                                  # ln2 beta
        jax.random.normal(ks[4], (D_MODEL, DIM_FF), jnp.float32) * scale_d,    # W1
        jnp.zeros((1, DIM_FF), jnp.float32),                                   # b1
        jax.random.normal(ks[5], (DIM_FF, D_MODEL), jnp.float32) * scale_ff,   # W2
        jnp.zeros((1, D_MODEL), jnp.float32),                                  # b2
    ]
    return params


def _reference(x, params):
    """Pure-JAX reference for sanity checking (mirrors the PyTorch forward)."""
    (ln1g, ln1b, wq, bq, wk, bk, wv, bv, wo, bo,
     ln2g, ln2b, w1, b1, w2, b2) = params

    def ln(x, g, b):
        mu = x.mean(-1, keepdims=True)
        var = ((x - mu) ** 2).mean(-1, keepdims=True)
        return (x - mu) / jnp.sqrt(var + LN_EPS) * g + b

    xn = ln(x, ln1g, ln1b)
    q = xn @ wq + bq
    k = xn @ wk + bk
    v = xn @ wv + bv
    qh = q.reshape(B, S, NUM_HEADS, D_HEAD).transpose(0, 2, 1, 3)
    kh = k.reshape(B, S, NUM_HEADS, D_HEAD).transpose(0, 2, 1, 3)
    vh = v.reshape(B, S, NUM_HEADS, D_HEAD).transpose(0, 2, 1, 3)
    s = jnp.einsum("bhqd,bhkd->bhqk", qh, kh) / math.sqrt(D_HEAD)
    p = jax.nn.softmax(s, axis=-1)
    a = jnp.einsum("bhqk,bhkd->bhqd", p, vh).transpose(0, 2, 1, 3).reshape(B, S, D_MODEL)
    x = x + (a @ wo + bo)
    xn2 = ln(x, ln2g, ln2b)
    f = jnp.maximum(xn2 @ w1 + b1, 0.0) @ w2 + b2
    return x + f


if __name__ == "__main__":
    key = jax.random.PRNGKey(0)
    kx, kp = jax.random.split(key)
    x = jax.random.normal(kx, (B, S, D_MODEL), jnp.float32)
    params = init_params(kp)

    # Pack once, outside the jitted hot path.
    w_all, vecs = pack_params(params)

    out = transformer_encoder_block(x, w_all, vecs)
    out = jax.block_until_ready(out)

    ref = _reference(x, params)
    assert out.shape == (B, S, D_MODEL)
    assert jnp.allclose(out, ref, atol=2e-3, rtol=2e-3), "mismatch vs reference"
    print("KERNEL_OK")
</pallas_src>

<mosaic_0001>
module attributes {stable_mosaic.version = 11 : i64} {
  func.func @encoder_block_kernel(%arg0: memref<16x32xf32, #tpu.memory_space<vmem>>, %arg1: memref<160x96xf32, #tpu.memory_space<vmem>>, %arg2: memref<8x96xf32, #tpu.memory_space<vmem>>, %arg3: memref<16x32xf32, #tpu.memory_space<vmem>>) attributes {dimension_semantics = [], scalar_prefetch = 0 : i64, scratch_operands = 0 : i64, tpu.core_type = #tpu.core_type<tc>} {
    %c0 = arith.constant 0 : index
    %c0_0 = arith.constant 0 : index
    %0 = vector.load %arg0[%c0, %c0_0] : memref<16x32xf32, #tpu.memory_space<vmem>>, vector<16x32xf32>
    %c0_1 = arith.constant 0 : index
    %c0_2 = arith.constant 0 : index
    %1 = vector.load %arg2[%c0_1, %c0_2] : memref<8x96xf32, #tpu.memory_space<vmem>>, vector<1x32xf32>
    %c1 = arith.constant 1 : index
    %c0_3 = arith.constant 0 : index
    %2 = vector.load %arg2[%c1, %c0_3] : memref<8x96xf32, #tpu.memory_space<vmem>>, vector<1x32xf32>
    %c2 = arith.constant 2 : index
    %c0_4 = arith.constant 0 : index
    %3 = vector.load %arg2[%c2, %c0_4] : memref<8x96xf32, #tpu.memory_space<vmem>>, vector<1x96xf32>
    %c3 = arith.constant 3 : index
    %c0_5 = arith.constant 0 : index
    %4 = vector.load %arg2[%c3, %c0_5] : memref<8x96xf32, #tpu.memory_space<vmem>>, vector<1x32xf32>
    %c4 = arith.constant 4 : index
    %c0_6 = arith.constant 0 : index
    %5 = vector.load %arg2[%c4, %c0_6] : memref<8x96xf32, #tpu.memory_space<vmem>>, vector<1x32xf32>
    %c5 = arith.constant 5 : index
    %c0_7 = arith.constant 0 : index
    %6 = vector.load %arg2[%c5, %c0_7] : memref<8x96xf32, #tpu.memory_space<vmem>>, vector<1x32xf32>
    %c6 = arith.constant 6 : index
    %c0_8 = arith.constant 0 : index
    %7 = vector.load %arg2[%c6, %c0_8] : memref<8x96xf32, #tpu.memory_space<vmem>>, vector<1x64xf32>
    %c7 = arith.constant 7 : index
    %c0_9 = arith.constant 0 : index
    %8 = vector.load %arg2[%c7, %c0_9] : memref<8x96xf32, #tpu.memory_space<vmem>>, vector<1x32xf32>
    %c0_10 = arith.constant 0 : index
    %c0_11 = arith.constant 0 : index
    %9 = vector.load %arg1[%c0_10, %c0_11] : memref<160x96xf32, #tpu.memory_space<vmem>>, vector<32x96xf32>
    %c32 = arith.constant 32 : index
    %c0_12 = arith.constant 0 : index
    %10 = vector.load %arg1[%c32, %c0_12] : memref<160x96xf32, #tpu.memory_space<vmem>>, vector<32x32xf32>
    %c64 = arith.constant 64 : index
    %c0_13 = arith.constant 0 : index
    %11 = vector.load %arg1[%c64, %c0_13] : memref<160x96xf32, #tpu.memory_space<vmem>>, vector<32x64xf32>
    %c96 = arith.constant 96 : index
    %c0_14 = arith.constant 0 : index
    %12 = vector.load %arg1[%c96, %c0_14] : memref<160x96xf32, #tpu.memory_space<vmem>>, vector<64x32xf32>
    %cst = arith.constant dense<0.000000e+00> : vector<16xf32>
    %13 = vector.multi_reduction <add>, %0, %cst [1] : vector<16x32xf32> to vector<16xf32>
    %14 = vector.shape_cast %13 : vector<16xf32> to vector<16x1xf32>
    %cst_15 = arith.constant 3.200000e+01 : f32
    %15 = vector.broadcast %cst_15 : f32 to vector<16x1xf32>
    %16 = arith.divf %14, %15 : vector<16x1xf32>
    %17 = vector.broadcast %16 : vector<16x1xf32> to vector<16x32xf32>
    %18 = arith.subf %0, %17 : vector<16x32xf32>
    %19 = arith.mulf %18, %18 : vector<16x32xf32>
    %cst_16 = arith.constant dense<0.000000e+00> : vector<16xf32>
    %20 = vector.multi_reduction <add>, %19, %cst_16 [1] : vector<16x32xf32> to vector<16xf32>
    %21 = vector.shape_cast %20 : vector<16xf32> to vector<16x1xf32>
    %cst_17 = arith.constant 3.200000e+01 : f32
    %22 = vector.broadcast %cst_17 : f32 to vector<16x1xf32>
    %23 = arith.divf %21, %22 : vector<16x1xf32>
    %cst_18 = arith.constant 9.99999974E-6 : f32
    %24 = vector.broadcast %cst_18 : f32 to vector<16x1xf32>
    %25 = arith.addf %23, %24 : vector<16x1xf32>
    %26 = math.rsqrt %25 : vector<16x1xf32>
    %27 = vector.broadcast %26 : vector<16x1xf32> to vector<16x32xf32>
    %28 = arith.mulf %18, %27 : vector<16x32xf32>
    %29 = vector.broadcast %1 : vector<1x32xf32> to vector<16x32xf32>
    %30 = arith.mulf %28, %29 : vector<16x32xf32>
    %31 = vector.broadcast %2 : vector<1x32xf32> to vector<16x32xf32>
    %32 = arith.addf %30, %31 : vector<16x32xf32>
    %cst_19 = arith.constant dense<0.000000e+00> : vector<16x96xf32>
    %33 = tpu.matmul %32, %9, %cst_19 {dimension_numbers = #tpu.dot_dimension_numbers<[1], [0], [0], [1], [0, 0, 1, 1], [], []>} : vector<16x32xf32>, vector<32x96xf32>, vector<16x96xf32> -> vector<16x96xf32>
    %34 = vector.broadcast %3 : vector<1x96xf32> to vector<16x96xf32>
    %35 = arith.addf %33, %34 : vector<16x96xf32>
    %36 = vector.extract_strided_slice %35 {offsets = [0, 0], sizes = [16, 32], strides = [1, 1]} : vector<16x96xf32> to vector<16x32xf32>
    %37 = vector.shape_cast %36 : vector<16x32xf32> to vector<2x8x4x8xf32>
    %38 = tpu.transpose %37, [0, 2, 1, 3] : vector<2x8x4x8xf32> -> vector<2x4x8x8xf32>
    %39 = vector.shape_cast %38 : vector<2x4x8x8xf32> to vector<8x8x8xf32>
    %40 = vector.extract_strided_slice %35 {offsets = [0, 32], sizes = [16, 32], strides = [1, 1]} : vector<16x96xf32> to vector<16x32xf32>
    %41 = vector.shape_cast %40 : vector<16x32xf32> to vector<2x8x4x8xf32>
    %42 = tpu.transpose %41, [0, 2, 1, 3] : vector<2x8x4x8xf32> -> vector<2x4x8x8xf32>
    %43 = vector.shape_cast %42 : vector<2x4x8x8xf32> to vector<8x8x8xf32>
    %44 = vector.extract_strided_slice %35 {offsets = [0, 64], sizes = [16, 32], strides = [1, 1]} : vector<16x96xf32> to vector<16x32xf32>
    %45 = vector.shape_cast %44 : vector<16x32xf32> to vector<2x8x4x8xf32>
    %46 = tpu.transpose %45, [0, 2, 1, 3] : vector<2x8x4x8xf32> -> vector<2x4x8x8xf32>
    %47 = vector.shape_cast %46 : vector<2x4x8x8xf32> to vector<8x8x8xf32>
    "tpu.trace_start"() <{level = 10 : i32, message = "nqd,nkd->nqk"}> : () -> ()
    %cst_20 = arith.constant dense<0.000000e+00> : vector<8x8x8xf32>
    %48 = tpu.matmul %39, %43, %cst_20 {dimension_numbers = #tpu.dot_dimension_numbers<[2], [2], [1], [1], [0, 0, 0, 1, 1, 1], [0], [0]>} : vector<8x8x8xf32>, vector<8x8x8xf32>, vector<8x8x8xf32> -> vector<8x8x8xf32>
    "tpu.trace_stop"() : () -> ()
    %cst_21 = arith.constant 0.353553385 : f32
    %49 = vector.broadcast %cst_21 : f32 to vector<8x8x8xf32>
    %50 = arith.mulf %48, %49 : vector<8x8x8xf32>
    %cst_22 = arith.constant dense<0xFF800000> : vector<8x8xf32>
    %51 = vector.multi_reduction <maximumf>, %50, %cst_22 [2] : vector<8x8x8xf32> to vector<8x8xf32>
    %52 = vector.shape_cast %51 : vector<8x8xf32> to vector<8x8x1xf32>
    %53 = vector.broadcast %52 : vector<8x8x1xf32> to vector<8x8x8xf32>
    %54 = arith.subf %50, %53 : vector<8x8x8xf32>
    %55 = math.exp %54 : vector<8x8x8xf32>
    %cst_23 = arith.constant dense<0.000000e+00> : vector<8x8xf32>
    %56 = vector.multi_reduction <add>, %55, %cst_23 [2] : vector<8x8x8xf32> to vector<8x8xf32>
    %57 = vector.shape_cast %56 : vector<8x8xf32> to vector<8x8x1xf32>
    %58 = vector.broadcast %57 : vector<8x8x1xf32> to vector<8x8x8xf32>
    %59 = arith.divf %55, %58 : vector<8x8x8xf32>
    "tpu.trace_start"() <{level = 10 : i32, message = "nqk,nkd->nqd"}> : () -> ()
    %cst_24 = arith.constant dense<0.000000e+00> : vector<8x8x8xf32>
    %60 = tpu.matmul %59, %47, %cst_24 {dimension_numbers = #tpu.dot_dimension_numbers<[2], [1], [1], [2], [0, 0, 0, 1, 1, 2], [0], [0]>} : vector<8x8x8xf32>, vector<8x8x8xf32>, vector<8x8x8xf32> -> vector<8x8x8xf32>
    "tpu.trace_stop"() : () -> ()
    %61 = vector.shape_cast %60 : vector<8x8x8xf32> to vector<2x4x8x8xf32>
    %62 = tpu.transpose %61, [0, 2, 1, 3] : vector<2x4x8x8xf32> -> vector<2x8x4x8xf32>
    %63 = vector.shape_cast %62 : vector<2x8x4x8xf32> to vector<16x32xf32>
    %cst_25 = arith.constant dense<0.000000e+00> : vector<16x32xf32>
    %64 = tpu.matmul %63, %10, %cst_25 {dimension_numbers = #tpu.dot_dimension_numbers<[1], [0], [0], [1], [0, 0, 1, 1], [], []>} : vector<16x32xf32>, vector<32x32xf32>, vector<16x32xf32> -> vector<16x32xf32>
    %65 = vector.broadcast %4 : vector<1x32xf32> to vector<16x32xf32>
    %66 = arith.addf %64, %65 : vector<16x32xf32>
    %67 = arith.addf %0, %66 : vector<16x32xf32>
    %cst_26 = arith.constant dense<0.000000e+00> : vector<16xf32>
    %68 = vector.multi_reduction <add>, %67, %cst_26 [1] : vector<16x32xf32> to vector<16xf32>
    %69 = vector.shape_cast %68 : vector<16xf32> to vector<16x1xf32>
    %cst_27 = arith.constant 3.200000e+01 : f32
    %70 = vector.broadcast %cst_27 : f32 to vector<16x1xf32>
    %71 = arith.divf %69, %70 : vector<16x1xf32>
    %72 = vector.broadcast %71 : vector<16x1xf32> to vector<16x32xf32>
    %73 = arith.subf %67, %72 : vector<16x32xf32>
    %74 = arith.mulf %73, %73 : vector<16x32xf32>
    %cst_28 = arith.constant dense<0.000000e+00> : vector<16xf32>
    %75 = vector.multi_reduction <add>, %74, %cst_28 [1] : vector<16x32xf32> to vector<16xf32>
    %76 = vector.shape_cast %75 : vector<16xf32> to vector<16x1xf32>
    %cst_29 = arith.constant 3.200000e+01 : f32
    %77 = vector.broadcast %cst_29 : f32 to vector<16x1xf32>
    %78 = arith.divf %76, %77 : vector<16x1xf32>
    %cst_30 = arith.constant 9.99999974E-6 : f32
    %79 = vector.broadcast %cst_30 : f32 to vector<16x1xf32>
    %80 = arith.addf %78, %79 : vector<16x1xf32>
    %81 = math.rsqrt %80 : vector<16x1xf32>
    %82 = vector.broadcast %81 : vector<16x1xf32> to vector<16x32xf32>
    %83 = arith.mulf %73, %82 : vector<16x32xf32>
    %84 = vector.broadcast %5 : vector<1x32xf32> to vector<16x32xf32>
    %85 = arith.mulf %83, %84 : vector<16x32xf32>
    %86 = vector.broadcast %6 : vector<1x32xf32> to vector<16x32xf32>
    %87 = arith.addf %85, %86 : vector<16x32xf32>
    %cst_31 = arith.constant dense<0.000000e+00> : vector<16x64xf32>
    %88 = tpu.matmul %87, %11, %cst_31 {dimension_numbers = #tpu.dot_dimension_numbers<[1], [0], [0], [1], [0, 0, 1, 1], [], []>} : vector<16x32xf32>, vector<32x64xf32>, vector<16x64xf32> -> vector<16x64xf32>
    %89 = vector.broadcast %7 : vector<1x64xf32> to vector<16x64xf32>
    %90 = arith.addf %88, %89 : vector<16x64xf32>
    %cst_32 = arith.constant 0.000000e+00 : f32
    %91 = vector.broadcast %cst_32 : f32 to vector<16x64xf32>
    %92 = arith.maximumf %90, %91 : vector<16x64xf32>
    %cst_33 = arith.constant dense<0.000000e+00> : vector<16x32xf32>
    %93 = tpu.matmul %92, %12, %cst_33 {dimension_numbers = #tpu.dot_dimension_numbers<[1], [0], [0], [1], [0, 0, 1, 1], [], []>} : vector<16x64xf32>, vector<64x32xf32>, vector<16x32xf32> -> vector<16x32xf32>
    %94 = vector.broadcast %8 : vector<1x32xf32> to vector<16x32xf32>
    %95 = arith.addf %93, %94 : vector<16x32xf32>
    %96 = arith.addf %67, %95 : vector<16x32xf32>
    %c0_34 = arith.constant 0 : index
    %c0_35 = arith.constant 0 : index
    %97 = vector.load %arg3[%c0_34, %c0_35] : memref<16x32xf32, #tpu.memory_space<vmem>>, vector<16x32xf32>
    tpu.vector_store %arg3[%c0_34, %c0_35], %96 {strides = array<i32>} : memref<16x32xf32, #tpu.memory_space<vmem>>, vector<16x32xf32>,
    return
  }
}

</mosaic_0001>

<bundles_post_ra>
// kernel: transformer_encoder_block.1
= control target key start
LH: loop header
LB: loop body
LE: loop exit
PB: predicated region body
PF: predicated region fallthrough
CT: control target
= control target key end

     0   :  { %8 = vsyncpa [#allocation3], 0  ;;  %s3852_s0 = inlined_call_operand.hbm [shape: f32[16,32], index: 0, kind: input, shape index: {}]   ;;  %s3853_s1 = inlined_call_operand.hbm [shape: f32[160,96], index: 1, kind: input, shape index: {}]   ;;  %s3854_s2 = inlined_call_operand.hbm [shape: f32[8,96], index: 2, kind: input, shape index: {}]   ;;  %s3855_s3 = inlined_call_operand.hbm [shape: f32[16,32], index: 3, kind: output, shape index: {}]  }
   0x1   :  { %9 = vsyncpa [#allocation6], 0 }
   0x2   :  { %10 = vsyncpa [#allocation4], 0  ;;  %s3399_s12 = smov [#allocation5]   ;;  %s3400_s14 = smov [#allocation2]  }
   0x3   :  { %s28_s13 = sshll.u32 %s3399_s12, 4  ;;  %s16_s15 = sshll.u32 %s3400_s14, 4  ;;  %s29_s13 = int_to_ptr.vmem [resolvable:$true] %s28_s13  ;;  %s17_s15 = int_to_ptr.vmem [resolvable:$true] %s16_s15 }
   0x4   :  { %s3321_s16 = scalar_lea.vmem %s29_s13, 2560  ;;  %p3326_p1 = scmp.lt.s32.totalorder %s29_s13, %s29_s13 }
   0x5   :  { %p3322_p0 = scmp.ne.s32.totalorder %s29_s13, %s3321_s16  ;;  %p3327_p2 = scmp.lt.s32.totalorder %s3321_s16, %s3321_s16 }
   0x7   :  { %p3328_p3 = por %p3327_p2, %p3326_p1 }
   0x9   :  { %p3329_p4 = pnand %p3328_p3, %p3322_p0 }
   0xb   :  { %3332 = shalt.err (!%p3329_p4)
}
   0xc   :  { %s3401_s17 = smov 128   ;;  %s3402_s18 = smov 8  }
   0xd   :  { %34 = dma.hbm_to_vmem [thread:$0]  %s3853_s1, 2560, %s29_s13, [#allocation6], %s3401_s17, %s3401_s17, %s3402_s18  }
   0xe   :  { %s3341_s21 = scalar_lea.vmem %s17_s15, 256  ;;  %p3346_p6 = scmp.lt.s32.totalorder %s17_s15, %s17_s15 }
   0xf   :  { %p3342_p5 = scmp.ne.s32.totalorder %s17_s15, %s3341_s21  ;;  %p3347_p7 = scmp.lt.s32.totalorder %s3341_s21, %s3341_s21 }
  0x11   :  { %p3348_p8 = por %p3347_p7, %p3346_p6 }
  0x13   :  { %p3349_p9 = pnand %p3348_p8, %p3342_p5 }
  0x15   :  { %3352 = shalt.err (!%p3349_p9)
}
  0x16   :  { %22 = dma.hbm_to_vmem [thread:$0]  %s3852_s0, 256, %s17_s15, [#allocation3], %s3401_s17, %s3401_s17, %s3402_s18  }
  0x17   :  { %s3403_s24 = smov [#allocation7]  }
  0x18   :  { %s41_s25 = sshll.u32 %s3403_s24, 4  ;;  %s42_s25 = int_to_ptr.vmem [resolvable:$true] %s41_s25 }
  0x19   :  { %s3361_s26 = scalar_lea.vmem %s42_s25, 128  ;;  %p3366_p11 = scmp.lt.s32.totalorder %s42_s25, %s42_s25 }
  0x1a   :  { %p3362_p10 = scmp.ne.s32.totalorder %s42_s25, %s3361_s26  ;;  %p3367_p12 = scmp.lt.s32.totalorder %s3361_s26, %s3361_s26 }
  0x1c   :  { %p3368_p13 = por %p3367_p12, %p3366_p11 }
  0x1e   :  { %p3369_p0 = pnand %p3368_p13, %p3362_p10 }
  0x20   :  { %3372 = shalt.err (!%p3369_p0)
}
  0x21   :  { %44 = dma.hbm_to_vmem [thread:$0]  %s3854_s2, 128, %s42_s25, [#allocation6]  }
  0x22   :  { %3393 = dma.done.wait [#allocation3], 256  }
  0x23   :  { %3394 = vsyncadd [#allocation3], 4294967040 }
  0x24   :  { %3395 = dma.done.wait [#allocation6], 2688  }
  0x25   :  { %3396 = vsyncadd [#allocation6], 4294964608  ;;  %vm84_vm0 = vcmask 261120   ;;  %v54_v0 = vld [vmem:[#allocation2] sm:$0xff]  ;;  %v55_v1 = vld [vmem:[#allocation2 + $0x8] sm:$0xff]  ;;  %s3404_s0 = smov 112   ;;  %v234_v48 = vlaneseq }
  0x26   :  { %v85_v2 = vsel %vm84_vm0, %v54_v0, 0.0  ;;  %v88_v3 = vsel %vm84_vm0, %v55_v1, 0.0  ;;  %v67_v14 = vld [vmem:[#allocation5 + $0x18] sm:$0xff]  ;;  %v66_v15 = vld [vmem:[#allocation5 + $0x10] sm:$0xff]  ;;  %v65_v16 = vld [vmem:[#allocation5 + $0x8] sm:$0xff]  ;;  %s3405_s2 = smov 120  }
  0x27   :  { %86 = vadd.xlane.f32.xlu0 %v85_v2  ;;  %3122 = vmatprep.subr.mxu1 %v67_v14  ;;  %v64_v17 = vld [vmem:[#allocation5] sm:$0xff]  ;;  %s3406_s28 = smov 104   ;;  %s3407_s29 = smov 96   ;;  %v3408_v44 = vmov 0.0   ;;  %vm3409_vm1 = vmmov 0   ;;  %v235_v50 = vshrl.u32 %v234_v48, 7 }
  0x28   :  { %3123 = vmatpush3.msra.mxu1 %v67_v14  ;;  %v3006_v25 = vld [vmem:[#allocation7] ss:$0 sm:$0xff]  ;;  %v3007_v27 = vld [vmem:[#allocation7 + $0x1] ss:$0 sm:$0xff]  ;;  %v3008_v35 = vld [vmem:[#allocation7 + $0x2] ss:$0 sm:$0xff]  ;;  %3143 = vmatprep.subr.mxu0 %v3408_v44 }
  0x29   :  { %3124 = vmatprep.subr.mxu1 %v66_v15  ;;  %3145 = vmatprep.mubr.msk.f32.mxu0 %vm3409_vm1, %v3408_v44  ;;  %v3410_v46 = vmov 1983009808   ;;  %v3411_v51 = vmov 1934713408   ;;  %vm1093_vm2 = vcmask 64512   ;;  %s3412_s30 = smov 64  }
  0x2a   :  { %3125 = vmatpush3.msra.mxu1 %v66_v15  ;;  %v232_v47 = vunpack.c.l.s4 %v3410_v46  ;;  %v264_v52 = vunpack.c.l.s4 %v3411_v51  ;;  %s3413_s4 = smov 16   ;;  %s3414_s5 = smov 24   ;;  %vm2680_vm3 = vcmask 130048   ;;  %vm2683_vm4 = vcmask 195584  }
  0x2b   :  { %89 = vadd.xlane.f32.xlu0 %v88_v3  ;;  %3126 = vmatprep.subr.mxu1 %v65_v16  ;;  %vm2902_vm5 = vcmask 523264   ;;  %s3415_s6 = smov [#allocation8]  }
  0x2c   :  { %3127 = vmatpush3.msra.mxu1 %v65_v16  ;;  %v233_v49 = vunpack.c.0.s8 %v232_v47  ;;  %v265_v58 = vunpack.c.0.s8 %v264_v52  ;;  %s2993_s7 = sshll.u32 %s3415_s6, 4  ;;  %s2994_s7 = int_to_ptr.vmem [resolvable:$true] %s2993_s7 }
  0x2d   :  { %3128 = vmatprep.subr.mxu1 %v64_v17  ;;  %s3373_s8 = scalar_lea.vmem %s2994_s7, 256  ;;  %p3378_p2 = scmp.lt.s32.totalorder %s2994_s7, %s2994_s7 }
  0x2e   :  { %3129 = vmatpush3.msra.mxu1 %v64_v17  ;;  %v3497_v55 = vsub.s32 %v233_v49, %v235_v50  ;;  %v3507_v63 = vsub.s32 %v265_v58, %v235_v50  ;;  %p3374_p1 = scmp.ne.s32.totalorder %s2994_s7, %s3373_s8  ;;  %p3379_p3 = scmp.lt.s32.totalorder %s3373_s8, %s3373_s8 }
  0x2f   :  { %3133 = vmatprep.subr.mxu1 %v3408_v44 }
  0x30   :  { %p3380_p4 = por %p3379_p3, %p3378_p2 }
  0x32   :  { %p3381_p5 = pnand %p3380_p4, %p3374_p1 }
  0xb0   :  { %v87_v4 = vpop.xlane.xlu0 %86 }
  0xb1   :  { %v92_v5 = vmul.f32 0.03125, %v87_v4 }
  0xb3   :  { %v94_v6 = vsub.f32 %v54_v0, %v92_v5 }
  0xb4   :  { %v90_v7 = vpop.xlane.xlu0 %89 }
  0xb5   :  { %v93_v8 = vmul.f32 0.03125, %v90_v7  ;;  %v96_v9 = vmul.f32 %v94_v6, %v94_v6 }
  0xb7   :  { %v95_v10 = vsub.f32 %v55_v1, %v93_v8  ;;  %v98_v11 = vsel %vm84_vm0, %v96_v9, 0.0 }
  0xb8   :  { %99 = vadd.xlane.f32.xlu1 %v98_v11 }
  0xb9   :  { %v97_v12 = vmul.f32 %v95_v10, %v95_v10 }
  0xbb   :  { %v101_v13 = vsel %vm84_vm0, %v97_v12, 0.0 }
  0xbc   :  { %102 = vadd.xlane.f32.xlu1 %v101_v13 }
 0x141   :  { %v100_v18 = vpop.xlane.xlu1 %99 }
 0x142   :  { %v104_v19 = vmul.f32 0.03125, %v100_v18 }
 0x144   :  { %v106_v20 = vadd.f32 1e-05, %v104_v19 }
 0x145   :  { %v103_v21 = vpop.xlane.xlu1 %102 }
 0x146   :  { %3271 = vrsqrt.f32 %v106_v20  ;;  %v105_v22 = vmul.f32 0.03125, %v103_v21 }
 0x148   :  { %v107_v23 = vadd.f32 1e-05, %v105_v22 }
 0x14a   :  { %3273 = vrsqrt.f32 %v107_v23 }
 0x153   :  { %v3272_v24 = vpop.eup %3271 }
 0x154   :  { %v110_v26 = vmul.f32 %v3272_v24, %v94_v6 }
 0x156   :  { %v116_v28 = vmul.f32 %v3006_v25, %v110_v26 }
 0x157   :  { %v3274_v29 = vpop.eup %3273 }
 0x158   :  { %v111_v30 = vmul.f32 %v3274_v29, %v95_v10  ;;  %v122_v31 = vadd.f32 %v3007_v27, %v116_v28 }
 0x15a   :  { %v117_v32 = vmul.f32 %v3006_v25, %v111_v30  ;;  %3130 = vmatprep.mubr.msk.f32.mxu1 %vm84_vm0, %v122_v31 }
 0x15c   :  { %v123_v33 = vadd.f32 %v3007_v27, %v117_v32 }
 0x15e   :  { %3131 = vmatmul.mubr.msk.f32.vlgmr.msra.gmra.mxu1 %vm84_vm0, %v123_v33 }
 0x15f   :  { %3135 = vmatprep.mubr.msk.f32.mxu1 %vm3409_vm1, %v3408_v44 }
 0x21e   :  { %v3132_v34 = vpop.f32.mrf.mxu1 }
 0x21f   :  { %v3461_v38 = vadd.f32 %v3132_v34, %v3008_v35 }
 0x220   :  { %v200_v36 = vpop.f32.mrf.mxu1 }
 0x221   :  { %v3457_v37 = vadd.f32 %v3008_v35, %v200_v36 }
 0x223   :  { %217 = vrot.lane.b32.xlu1 %v3457_v37, %s3404_s0  ;;  %211 = vrot.lane.b32.xlu0 %v3457_v37, %s3405_s2 }
 0x227   :  { %223 = vrot.lane.b32.xlu1 %v3457_v37, %s3406_s28  ;;  %219 = vrot.lane.b32.xlu0 %v3461_v38, %s3404_s0 }
 0x22b   :  { %213 = vrot.lane.b32.xlu1 %v3461_v38, %s3405_s2  ;;  %501 = vrot.lane.b32.xlu0 %v3457_v37, %s3407_s29 }
 0x22f   :  { %225 = vrot.lane.b32.xlu1 %v3461_v38, %s3406_s28 }
 0x295   :  { %v3468_v39 = vpop.permute.xlu1 %217  ;;  %v3470_v40 = vpop.permute.xlu0 %211 }
 0x296   :  { %509 = vrot.lane.b32.xlu0 %v3468_v39, %s3407_s29  ;;  %505 = vrot.lane.b32.xlu1 %v3470_v40, %s3407_s29  ;;  %v229_v56 = vcombine.low %v3457_v37, %v3468_v39  ;;  %v230_v57 = vcombine.high %v3457_v37, %v3468_v39 }
 0x298   :  { %v237_v61 = vrot.slane %v229_v56, %v3497_v55  ;;  %v244_v62 = vrot.slane %v230_v57, %v3497_v55 }
 0x299   :  { %v3474_v41 = vpop.permute.xlu1 %223  ;;  %v3478_v42 = vpop.permute.xlu0 %219 }
 0x29a   :  { %503 = vrot.lane.b32.xlu0 %v3461_v38, %s3407_s29  ;;  %513 = vrot.lane.b32.xlu1 %v3474_v41, %s3407_s29  ;;  %v245_v53 = vcombine.low %v3470_v40, %v3474_v41  ;;  %v246_v54 = vcombine.high %v3470_v40, %v3474_v41  ;;  %v297_v10 = vcombine.low %v3461_v38, %v3478_v42 }
 0x29b   :  { %v298_v16 = vcombine.high %v3461_v38, %v3478_v42 }
 0x29c   :  { %v253_v59 = vrot.slane %v245_v53, %v3497_v55  ;;  %v260_v60 = vrot.slane %v246_v54, %v3497_v55  ;;  %v305_v19 = vrot.slane %v297_v10, %v3497_v55 }
 0x29d   :  { %v3480_v43 = vpop.permute.xlu1 %213  ;;  %v502_v11 = vpop.permute.xlu0 %501  ;;  %v312_v26 = vrot.slane %v298_v16, %v3497_v55 }
 0x29e   :  { %511 = vrot.lane.b32.xlu0 %v3478_v42, %s3407_s29  ;;  %507 = vrot.lane.b32.xlu1 %v3480_v43, %s3407_s29  ;;  %v261_v0 = vcombine.low %v237_v61, %v253_v59  ;;  %v262_v1 = vcombine.high %v237_v61, %v253_v59  ;;  %v277_v2 = vcombine.low %v244_v62, %v260_v60 }
 0x29f   :  { %v278_v3 = vcombine.high %v244_v62, %v260_v60 }
 0x2a0   :  { %v269_v4 = vrot.slane %v261_v0, %v3507_v63  ;;  %v276_v5 = vrot.slane %v262_v1, %v3507_v63  ;;  %v285_v6 = vrot.slane %v277_v2, %v3507_v63 }
 0x2a1   :  { %v3485_v45 = vpop.permute.xlu1 %225  ;;  %v292_v7 = vrot.slane %v278_v3, %v3507_v63 }
 0x2a2   :  { %515 = vrot.lane.b32.xlu1 %v3485_v45, %s3407_s29  ;;  %v313_v8 = vcombine.low %v3480_v43, %v3485_v45  ;;  %v365_v9 = vcombine.low %v269_v4, %v276_v5  ;;  %v3011_v12 = vcombine.high %v269_v4, %v276_v5  ;;  %v314_v15 = vcombine.high %v3480_v43, %v3485_v45 }
 0x2a3   :  { %v381_v13 = vcombine.low %v285_v6, %v292_v7  ;;  %v3012_v14 = vcombine.high %v285_v6, %v292_v7 }
 0x2a4   :  { %v321_v17 = vrot.slane %v313_v8, %v3497_v55  ;;  %v372_v18 = vrot.slane %v365_v9, %v3497_v55  ;;  %v380_v22 = vrot.slane %v3011_v12, %v3497_v55  ;;  %v328_v25 = vrot.slane %v314_v15, %v3497_v55 }
 0x2a5   :  { %v388_v23 = vrot.slane %v381_v13, %v3497_v55  ;;  %v396_v24 = vrot.slane %v3012_v14, %v3497_v55 }
 0x2a6   :  { %v329_v27 = vcombine.low %v305_v19, %v321_v17  ;;  %v330_v28 = vcombine.high %v305_v19, %v321_v17  ;;  %v345_v32 = vcombine.low %v312_v26, %v328_v25  ;;  %v346_v33 = vcombine.high %v312_v26, %v328_v25 }
 0x2a7   :  { %v397_v35 = vcombine.low %v372_v18, %v380_v22  ;;  %v413_v36 = vcombine.low %v388_v23, %v396_v24  ;;  %v398_v50 = vcombine.high %v372_v18, %v380_v22  ;;  %v414_v51 = vcombine.high %v388_v23, %v396_v24 }
 0x2a8   :  { %v337_v48 = vrot.slane %v329_v27, %v3507_v63  ;;  %v344_v49 = vrot.slane %v330_v28, %v3507_v63  ;;  %v353_v57 = vrot.slane %v345_v32, %v3507_v63  ;;  %v360_v58 = vrot.slane %v346_v33, %v3507_v63 }
 0x2a9   :  { %v3538_v60 = vrot.slane %v397_v35, %v3507_v63  ;;  %v3541_v61 = vrot.slane %v413_v36, %v3507_v63  ;;  %v3544_v6 = vrot.slane %v398_v50, %v3507_v63  ;;  %v3547_v7 = vrot.slane %v414_v51, %v3507_v63 }
 0x2aa   :  { %v433_v4 = vcombine.low %v337_v48, %v344_v49  ;;  %v3013_v5 = vcombine.high %v337_v48, %v344_v49  ;;  %v449_v12 = vcombine.low %v353_v57, %v360_v58  ;;  %v3014_v13 = vcombine.high %v353_v57, %v360_v58 }
 0x2ac   :  { %v3557_v22 = vrot.slane %v3013_v5, %v3497_v55 }
 0x308   :  { %v506_v20 = vpop.permute.xlu1 %505  ;;  %v510_v21 = vpop.permute.xlu0 %509 }
 0x309   :  { %v525_v29 = vcombine.low %v502_v11, %v510_v21  ;;  %v526_v30 = vcombine.high %v502_v11, %v510_v21  ;;  %v3554_v21 = vrot.slane %v433_v4, %v3497_v55 }
 0x30b   :  { %v533_v52 = vrot.slane %v525_v29, %v3497_v55  ;;  %v540_v53 = vrot.slane %v526_v30, %v3497_v55 }
 0x30c   :  { %v504_v31 = vpop.permute.xlu0 %503  ;;  %v514_v34 = vpop.permute.xlu1 %513 }
 0x30d   :  { %v541_v46 = vcombine.low %v506_v20, %v514_v34  ;;  %v542_v47 = vcombine.high %v506_v20, %v514_v34 }
 0x30f   :  { %v549_v54 = vrot.slane %v541_v46, %v3497_v55  ;;  %v556_v56 = vrot.slane %v542_v47, %v3497_v55 }
 0x310   :  { %v508_v59 = vpop.permute.xlu1 %507  ;;  %v512_v3 = vpop.permute.xlu0 %511 }
 0x311   :  { %v557_v62 = vcombine.low %v533_v52, %v549_v54  ;;  %v558_v0 = vcombine.high %v533_v52, %v549_v54  ;;  %v573_v1 = vcombine.low %v540_v53, %v556_v56  ;;  %v574_v2 = vcombine.high %v540_v53, %v556_v56 }
 0x312   :  { %v593_v14 = vcombine.low %v504_v31, %v512_v3  ;;  %v594_v15 = vcombine.high %v504_v31, %v512_v3 }
 0x313   :  { %v565_v8 = vrot.slane %v557_v62, %v3507_v63  ;;  %v572_v9 = vrot.slane %v558_v0, %v3507_v63  ;;  %v581_v10 = vrot.slane %v573_v1, %v3507_v63  ;;  %v588_v11 = vrot.slane %v574_v2, %v3507_v63 }
 0x314   :  { %v516_v16 = vpop.permute.xlu1 %515  ;;  %v601_v29 = vrot.slane %v593_v14, %v3497_v55  ;;  %v608_v30 = vrot.slane %v594_v15, %v3497_v55  ;;  %v464_v62 = vrot.slane %v3014_v13, %v3497_v55  ;;  %v431_v13 = vcombine.low %v3544_v6, %v3547_v7 }
 0x315   :  { %v661_v17 = vcombine.low %v565_v8, %v572_v9  ;;  %v3015_v18 = vcombine.high %v565_v8, %v572_v9  ;;  %v677_v19 = vcombine.low %v581_v10, %v588_v11  ;;  %v3016_v20 = vcombine.high %v581_v10, %v588_v11 }
 0x316   :  { %v609_v23 = vcombine.low %v508_v59, %v516_v16  ;;  %v610_v24 = vcombine.high %v508_v59, %v516_v16  ;;  %v456_v59 = vrot.slane %v449_v12, %v3497_v55  ;;  %v429_v8 = vcombine.low %v3538_v60, %v3541_v61 }
 0x317   :  { %v668_v25 = vrot.slane %v661_v17, %v3497_v55  ;;  %v676_v26 = vrot.slane %v3015_v18, %v3497_v55  ;;  %v684_v27 = vrot.slane %v677_v19, %v3497_v55  ;;  %v692_v28 = vrot.slane %v3016_v20, %v3497_v55 }
 0x318   :  { %v617_v31 = vrot.slane %v609_v23, %v3497_v55  ;;  %v624_v32 = vrot.slane %v610_v24, %v3497_v55  ;;  %v465_v15 = vcombine.low %v3554_v21, %v3557_v22  ;;  %v481_v16 = vcombine.low %v456_v59, %v464_v62 }
 0x319   :  { %v693_v33 = vcombine.low %v668_v25, %v676_v26  ;;  %v709_v34 = vcombine.low %v684_v27, %v692_v28  ;;  %v694_v35 = vcombine.high %v668_v25, %v676_v26  ;;  %v710_v36 = vcombine.high %v684_v27, %v692_v28 }
 0x31a   :  { %v625_v46 = vcombine.low %v601_v29, %v617_v31  ;;  %v626_v47 = vcombine.high %v601_v29, %v617_v31  ;;  %v641_v48 = vcombine.low %v608_v30, %v624_v32  ;;  %v642_v49 = vcombine.high %v608_v30, %v624_v32 }
 0x31b   :  { %v701_v50 = vrot.slane %v693_v33, %v3507_v63  ;;  %v717_v51 = vrot.slane %v709_v34, %v3507_v63  ;;  %v708_v52 = vrot.slane %v694_v35, %v3507_v63  ;;  %v724_v53 = vrot.slane %v710_v36, %v3507_v63 }
 0x31c   :  { %v633_v54 = vrot.slane %v625_v46, %v3507_v63  ;;  %v640_v56 = vrot.slane %v626_v47, %v3507_v63  ;;  %v649_v57 = vrot.slane %v641_v48, %v3507_v63  ;;  %v656_v58 = vrot.slane %v642_v49, %v3507_v63 }
 0x31d   :  { %v725_v0 = vcombine.low %v701_v50, %v717_v51  ;;  %v727_v1 = vcombine.low %v708_v52, %v724_v53  ;;  %v726_v14 = vcombine.high %v701_v50, %v717_v51  ;;  %v430_v23 = vcombine.high %v3538_v60, %v3541_v61 }
 0x31e   :  { %v729_v2 = vcombine.low %v633_v54, %v640_v56  ;;  %v3017_v3 = vcombine.high %v633_v54, %v640_v56  ;;  %v745_v4 = vcombine.low %v649_v57, %v656_v58  ;;  %v3018_v5 = vcombine.high %v649_v57, %v656_v58 }
 0x31f   :  { %3134 = vmatpush3.xpose.msk.msra.mxu1 %vm1093_vm2, %v725_v0  ;;  %3144 = vmatpush3.xpose.msk.msra.mxu0 %vm1093_vm2, %v727_v1  ;;  %v466_v26 = vcombine.high %v3554_v21, %v3557_v22  ;;  %v728_v27 = vcombine.high %v708_v52, %v724_v53  ;;  %v473_v28 = vrot.slane %v465_v15, %v3507_v63 }
 0x320   :  { %v736_v9 = vrot.slane %v729_v2, %v3497_v55  ;;  %v744_v10 = vrot.slane %v3017_v3, %v3497_v55  ;;  %v752_v11 = vrot.slane %v745_v4, %v3497_v55  ;;  %v760_v12 = vrot.slane %v3018_v5, %v3497_v55  ;;  %3138 = vmatprep.subr.mxu1 %v3408_v44 }
 0x321   :  { %3153 = vmatprep.subr.mxu0 %v3408_v44  ;;  %v489_v60 = vrot.slane %v481_v16, %v3507_v63  ;;  %v482_v61 = vcombine.high %v456_v59, %v464_v62  ;;  %v432_v21 = vcombine.high %v3544_v6, %v3547_v7  ;;  %v480_v33 = vrot.slane %v466_v26, %v3507_v63 }
 0x322   :  { %v761_v17 = vcombine.low %v736_v9, %v744_v10  ;;  %v762_v18 = vcombine.high %v736_v9, %v744_v10  ;;  %v777_v19 = vcombine.low %v752_v11, %v760_v12  ;;  %v778_v20 = vcombine.high %v752_v11, %v760_v12  ;;  %3136 = vmatmul.mubr.msk.f32.vlgmr.msra.gmra.mxu1 %vm1093_vm2, %v429_v8 }
 0x323   :  { %3146 = vmatmul.mubr.msk.f32.vlgmr.msra.gmra.mxu0 %vm1093_vm2, %v431_v13  ;;  %3139 = vmatpush3.xpose.msk.msra.mxu1 %vm1093_vm2, %v726_v14  ;;  %v497_v22 = vcombine.low %v473_v28, %v489_v60  ;;  %v496_v34 = vrot.slane %v482_v61, %v3507_v63  ;;  %v498_v6 = vcombine.high %v473_v28, %v489_v60 }
 0x324   :  { %3140 = vmatprep.mubr.msk.f32.mxu1 %vm3409_vm1, %v3408_v44  ;;  %3148 = vmatprep.subr.mxu1 %v3408_v44  ;;  %v769_v24 = vrot.slane %v761_v17, %v3507_v63  ;;  %v785_v25 = vrot.slane %v777_v19, %v3507_v63  ;;  %v776_v30 = vrot.slane %v762_v18, %v3507_v63 }
 0x325   :  { %3155 = vmatprep.mubr.msk.f32.mxu0 %vm3409_vm1, %v3408_v44  ;;  %v792_v31 = vrot.slane %v778_v20, %v3507_v63  ;;  %v499_v7 = vcombine.low %v480_v33, %v496_v34  ;;  %v500_v46 = vcombine.high %v480_v33, %v496_v34 }
 0x326   :  { %3141 = vmatmul.mubr.msk.f32.vlgmr.msra.gmra.mxu1 %vm1093_vm2, %v430_v23  ;;  %v793_v29 = vcombine.low %v769_v24, %v785_v25  ;;  %v794_v32 = vcombine.high %v769_v24, %v785_v25 }
 0x327   :  { %3149 = vmatpush3.xpose.msk.msra.mxu1 %vm1093_vm2, %v728_v27  ;;  %3150 = vmatprep.mubr.msk.f32.mxu1 %vm3409_vm1, %v3408_v44  ;;  %v795_v35 = vcombine.low %v776_v30, %v792_v31  ;;  %v796_v36 = vcombine.high %v776_v30, %v792_v31 }
 0x328   :  { %3154 = vmatpush3.xpose.msk.msra.mxu0 %vm1093_vm2, %v793_v29  ;;  %3158 = vmatprep.subr.mxu1 %v3408_v44 }
 0x329   :  { %3163 = vmatprep.subr.mxu0 %v3408_v44 }
 0x32a   :  { %3151 = vmatmul.mubr.msk.f32.vlgmr.msra.gmra.mxu1 %vm1093_vm2, %v432_v21 }
 0x32b   :  { %3156 = vmatmul.mubr.msk.f32.vlgmr.msra.gmra.mxu0 %vm1093_vm2, %v497_v22  ;;  %3159 = vmatpush3.xpose.msk.msra.mxu1 %vm1093_vm2, %v794_v32 }
 0x32c   :  { %3164 = vmatpush3.xpose.msk.msra.mxu0 %vm1093_vm2, %v795_v35  ;;  %3160 = vmatprep.mubr.msk.f32.mxu1 %vm3409_vm1, %v3408_v44 }
 0x32d   :  { %3165 = vmatprep.mubr.msk.f32.mxu0 %vm3409_vm1, %v3408_v44  ;;  %3168 = vmatprep.subr.mxu1 %v3408_v44 }
 0x32e   :  { %3161 = vmatmul.mubr.msk.f32.vlgmr.msra.gmra.mxu1 %vm1093_vm2, %v498_v6  ;;  %3173 = vmatprep.subr.mxu0 %v3408_v44 }
 0x32f   :  { %3166 = vmatmul.mubr.msk.f32.vlgmr.msra.gmra.mxu0 %vm1093_vm2, %v499_v7  ;;  %3169 = vmatpush3.xpose.msk.msra.mxu1 %vm1093_vm2, %v796_v36 }
 0x330   :  { %3170 = vmatprep.mubr.msk.f32.mxu1 %vm3409_vm1, %v3408_v44  ;;  %3178 = vmatprep.subr.mxu1 %v3408_v44 }
 0x331   :  { %3175 = vmatprep.mubr.msk.f32.mxu0 %vm3409_vm1, %v3408_v44 }
 0x332   :  { %3171 = vmatmul.mubr.msk.f32.vlgmr.msra.gmra.mxu1 %vm1093_vm2, %v500_v46 }
 0x333   :  { %3180 = vmatprep.mubr.msk.f32.mxu1 %vm3409_vm1, %v3408_v44 }
 0x3e2   :  { %v1166_v47 = vpop.f32.mrf.mxu1 }
 0x3e3   :  { %v1702_v48 = vmul.f32 0.35355338, %v1166_v47  ;;  %v1318_v49 = vpop.f32.mrf.mxu0 }
 0x3e4   :  { %v3137_v50 = vpop.f32.mrf.mxu1  ;;  %v1704_v51 = vmul.f32 0.35355338, %v1318_v49 }
 0x3e5   :  { %v3147_v52 = vpop.f32.mrf.mxu0  ;;  %v1710_v53 = vsel %vm1093_vm2, %v1702_v48, -inf }
 0x3e6   :  { %1711 = vmax.xlane.f32.xlu0 %v1710_v53  ;;  %v1242_v54 = vpop.f32.mrf.mxu1  ;;  %v1716_v58 = vsel %vm1093_vm2, %v1704_v51, -inf }
 0x3e7   :  { %v1703_v56 = vmul.f32 0.35355338, %v1242_v54 }
 0x3e8   :  { %v3142_v57 = vpop.f32.mrf.mxu1 }
 0x3e9   :  { %v1713_v59 = vsel %vm1093_vm2, %v1703_v56, -inf }
 0x3ea   :  { %1717 = vmax.xlane.f32.xlu0 %v1716_v58  ;;  %1714 = vmax.xlane.f32.xlu1 %v1713_v59  ;;  %v1394_v62 = vpop.f32.mrf.mxu1 }
 0x3eb   :  { %v1470_v0 = vpop.f32.mrf.mxu0  ;;  %v1705_v4 = vmul.f32 0.35355338, %v1394_v62 }
 0x3ec   :  { %v1706_v1 = vmul.f32 0.35355338, %v1470_v0  ;;  %v3152_v2 = vpop.f32.mrf.mxu1 }
 0x3ed   :  { %v3157_v3 = vpop.f32.mrf.mxu0  ;;  %v1719_v13 = vsel %vm1093_vm2, %v1705_v4, -inf }
 0x3ee   :  { %v1546_v5 = vpop.f32.mrf.mxu1  ;;  %v1722_v8 = vsel %vm1093_vm2, %v1706_v1, -inf }
 0x3ef   :  { %1723 = vmax.xlane.f32.xlu0 %v1722_v8  ;;  %v1622_v9 = vpop.f32.mrf.mxu0  ;;  %v3654_v15 = vmul.f32 0.35355338, %v1546_v5 }
 0x3f0   :  { %v3162_v10 = vpop.f32.mrf.mxu1  ;;  %v3656_v16 = vmul.f32 0.35355338, %v1622_v9 }
 0x3f1   :  { %v3167_v11 = vpop.f32.mrf.mxu0  ;;  %v1725_v18 = vsel %vm1093_vm2, %v3654_v15, -inf }
 0x3f2   :  { %v1698_v12 = vpop.f32.mrf.mxu1 }
 0x3f3   :  { %1720 = vmax.xlane.f32.xlu0 %v1719_v13  ;;  %v3658_v17 = vmul.f32 0.35355338, %v1698_v12 }
 0x3f4   :  { %v3172_v14 = vpop.f32.mrf.mxu1 }
 0x3fb   :  { %801 = vrot.lane.b32.xlu1 %v3470_v40, %s3412_s30  ;;  %v1728_v40 = vsel %vm1093_vm2, %v3656_v16, -inf }
 0x3ff   :  { %805 = vrot.lane.b32.xlu1 %v3468_v39, %s3412_s30  ;;  %v1731_v39 = vsel %vm1093_vm2, %v3658_v17, -inf }
 0x403   :  { %809 = vrot.lane.b32.xlu1 %v3474_v41, %s3412_s30 }
 0x409   :  { %797 = vrot.lane.b32.xlu0 %v3457_v37, %s3412_s30 }
 0x427   :  { %1726 = vmax.xlane.f32.xlu1 %v1725_v18 }
 0x428   :  { %1729 = vmax.xlane.f32.xlu0 %v1728_v40 }
 0x42b   :  { %1732 = vmax.xlane.f32.xlu1 %v1731_v39 }
 0x43c   :  { %803 = vrot.lane.b32.xlu1 %v3480_v43, %s3412_s30 }
 0x43e   :  { %799 = vrot.lane.b32.xlu0 %v3461_v38, %s3412_s30 }
 0x46f   :  { %v1712_v37 = vpop.xlane.xlu0 %1711 }
 0x470   :  { %v1734_v41 = vsub.f32 %v1702_v48, %v1712_v37 }
 0x472   :  { %v1742_v19 = vmul.f32 1.442695, %v1734_v41 }
 0x473   :  { %v1715_v20 = vpop.xlane.xlu1 %1714  ;;  %v1718_v23 = vpop.xlane.xlu0 %1717 }
 0x474   :  { %3275 = vpow2.f32 %v1742_v19  ;;  %v1735_v24 = vsub.f32 %v1703_v56, %v1715_v20  ;;  %v1736_v25 = vsub.f32 %v1704_v51, %v1718_v23 }
 0x476   :  { %v1744_v26 = vmul.f32 1.442695, %v1735_v24  ;;  %v1746_v27 = vmul.f32 1.442695, %v1736_v25 }
 0x477   :  { %v802_v28 = vpop.permute.xlu1 %801 }
 0x478   :  { %3277 = vpow2.f32 %v1744_v26  ;;  %v1724_v60 = vpop.xlane.xlu0 %1723 }
 0x479   :  { %3279 = vpow2.f32 %v1746_v27  ;;  %v1738_v61 = vsub.f32 %v1706_v1, %v1724_v60 }
 0x47b   :  { %v1750_v29 = vmul.f32 1.442695, %v1738_v61  ;;  %v806_v43 = vpop.permute.xlu1 %805 }
 0x47c   :  { %v1721_v30 = vpop.xlane.xlu0 %1720 }
 0x47d   :  { %3281 = vpow2.f32 %v1750_v29  ;;  %v1737_v38 = vsub.f32 %v1705_v4, %v1721_v30 }
 0x47f   :  { %v1748_v31 = vmul.f32 1.442695, %v1737_v38  ;;  %v810_v21 = vpop.permute.xlu1 %809 }
 0x480   :  { %v837_v22 = vcombine.low %v802_v28, %v810_v21  ;;  %v838_v32 = vcombine.high %v802_v28, %v810_v21  ;;  %v798_v33 = vpop.permute.xlu0 %797 }
 0x481   :  { %v3670_v34 = vpop.eup %3275  ;;  %3283 = vpow2.f32 %v1748_v31  ;;  %v821_v35 = vcombine.low %v798_v33, %v806_v43  ;;  %v822_v6 = vcombine.high %v798_v33, %v806_v43 }
 0x482   :  { %v845_v7 = vrot.slane %v837_v22, %v3497_v55  ;;  %v852_v36 = vrot.slane %v838_v32, %v3497_v55  ;;  %v1758_v46 = vsel %vm1093_vm2, %v3670_v34, 0.0 }
 0x483   :  { %v829_v47 = vrot.slane %v821_v35, %v3497_v55  ;;  %v836_v48 = vrot.slane %v822_v6, %v3497_v55  ;;  %1759 = vadd.xlane.f32.xlu0 %v1758_v46 }
 0x485   :  { %v3678_v49 = vpop.eup %3277  ;;  %v853_v50 = vcombine.low %v829_v47, %v845_v7  ;;  %v854_v51 = vcombine.high %v829_v47, %v845_v7  ;;  %v869_v52 = vcombine.low %v836_v48, %v852_v36  ;;  %v870_v53 = vcombine.high %v836_v48, %v852_v36 }
 0x486   :  { %v3680_v54 = vpop.eup %3279  ;;  %v1761_v56 = vsel %vm1093_vm2, %v3678_v49, 0.0 }
 0x487   :  { %v861_v57 = vrot.slane %v853_v50, %v3507_v63  ;;  %v868_v58 = vrot.slane %v854_v51, %v3507_v63  ;;  %v877_v59 = vrot.slane %v869_v52, %v3507_v63  ;;  %v884_v62 = vrot.slane %v870_v53, %v3507_v63  ;;  %1762 = vadd.xlane.f32.xlu1 %v1761_v56 }
 0x488   :  { %v1764_v0 = vsel %vm1093_vm2, %v3680_v54, 0.0 }
 0x489   :  { %v957_v1 = vcombine.low %v861_v57, %v868_v58  ;;  %v3019_v2 = vcombine.high %v861_v57, %v868_v58  ;;  %v973_v3 = vcombine.low %v877_v59, %v884_v62  ;;  %v3020_v4 = vcombine.high %v877_v59, %v884_v62  ;;  %1765 = vadd.xlane.f32.xlu0 %v1764_v0 }
 0x48a   :  { %v3690_v5 = vpop.eup %3281 }
 0x48b   :  { %v964_v8 = vrot.slane %v957_v1, %v3497_v55  ;;  %v972_v9 = vrot.slane %v3019_v2, %v3497_v55  ;;  %v980_v10 = vrot.slane %v973_v3, %v3497_v55  ;;  %v988_v11 = vrot.slane %v3020_v4, %v3497_v55 }
 0x48c   :  { %v1770_v12 = vsel %vm1093_vm2, %v3690_v5, 0.0 }
 0x48d   :  { %1771 = vadd.xlane.f32.xlu0 %v1770_v12  ;;  %v989_v13 = vcombine.low %v964_v8, %v972_v9  ;;  %v1005_v14 = vcombine.low %v980_v10, %v988_v11  ;;  %v990_v18 = vcombine.high %v964_v8, %v972_v9  ;;  %v1006_v40 = vcombine.high %v980_v10, %v988_v11 }
 0x48e   :  { %v3698_v39 = vpop.eup %3283 }
 0x48f   :  { %v1767_v37 = vsel %vm1093_vm2, %v3698_v39, 0.0  ;;  %v997_v41 = vrot.slane %v989_v13, %v3507_v63  ;;  %v1013_v19 = vrot.slane %v1005_v14, %v3507_v63  ;;  %v1004_v20 = vrot.slane %v990_v18, %v3507_v63 }
 0x490   :  { %1768 = vadd.xlane.f32.xlu1 %v1767_v37  ;;  %v1020_v23 = vrot.slane %v1006_v40, %v3507_v63 }
 0x491   :  { %v1021_v24 = vcombine.low %v997_v41, %v1013_v19  ;;  %v1022_v25 = vcombine.high %v997_v41, %v1013_v19 }
 0x492   :  { %v1023_v26 = vcombine.low %v1004_v20, %v1020_v23  ;;  %v1024_v27 = vcombine.high %v1004_v20, %v1020_v23 }
 0x493   :  { %3174 = vmatpush3.msra.mxu0 %v1021_v24  ;;  %3179 = vmatpush3.msra.mxu1 %v1022_v25 }
 0x494   :  { %3183 = vmatprep.subr.mxu0 %v3408_v44  ;;  %3188 = vmatprep.subr.mxu1 %v3408_v44 }
 0x4b0   :  { %v1727_v28 = vpop.xlane.xlu1 %1726 }
 0x4b1   :  { %v1739_v60 = vsub.f32 %v3654_v15, %v1727_v28  ;;  %v1730_v61 = vpop.xlane.xlu0 %1729 }
 0x4b2   :  { %v1740_v29 = vsub.f32 %v3656_v16, %v1730_v61 }
 0x4b3   :  { %v1752_v43 = vmul.f32 1.442695, %v1739_v60 }
 0x4b4   :  { %v1754_v30 = vmul.f32 1.442695, %v1740_v29  ;;  %v1733_v38 = vpop.xlane.xlu1 %1732 }
 0x4b5   :  { %3285 = vpow2.f32 %v1752_v43  ;;  %v1741_v31 = vsub.f32 %v3658_v17, %v1733_v38  ;;  %v800_v35 = vpop.permute.xlu0 %799 }
 0x4b6   :  { %3287 = vpow2.f32 %v1754_v30 }
 0x4b7   :  { %v1756_v21 = vmul.f32 1.442695, %v1741_v31 }
 0x4b8   :  { %v804_v6 = vpop.permute.xlu1 %803 }
 0x4b9   :  { %3289 = vpow2.f32 %v1756_v21 }
 0x4c2   :  { %v3711_v22 = vpop.eup %3285 }
 0x4c3   :  { %v3713_v32 = vpop.eup %3287  ;;  %v1773_v33 = vsel %vm1093_vm2, %v3711_v22, 0.0 }
 0x4c4   :  { %1774 = vadd.xlane.f32.xlu1 %v1773_v33  ;;  %v1776_v15 = vsel %vm1093_vm2, %v3713_v32, 0.0 }
 0x4c5   :  { %1777 = vadd.xlane.f32.xlu0 %v1776_v15 }
 0x4c6   :  { %v3719_v16 = vpop.eup %3289 }
 0x4c7   :  { %v1779_v17 = vsel %vm1093_vm2, %v3719_v16, 0.0 }
 0x4c8   :  { %1780 = vadd.xlane.f32.xlu1 %v1779_v17 }
 0x4d9   :  { %811 = vrot.lane.b32.xlu1 %v3485_v45, %s3412_s30 }
 0x4db   :  { %807 = vrot.lane.b32.xlu0 %v3478_v42, %s3412_s30 }
 0x50c   :  { %v1760_v7 = vpop.xlane.xlu0 %1759 }
 0x50d   :  { %3291 = vrcp.f32 %v1760_v7 }
 0x510   :  { %v1763_v36 = vpop.xlane.xlu1 %1762 }
 0x511   :  { %3293 = vrcp.f32 %v1763_v36 }
 0x512   :  { %v1766_v46 = vpop.xlane.xlu0 %1765 }
 0x513   :  { %3295 = vrcp.f32 %v1766_v46 }
 0x516   :  { %v1772_v53 = vpop.xlane.xlu0 %1771 }
 0x519   :  { %v1769_v47 = vpop.xlane.xlu1 %1768 }
 0x51a   :  { %v3292_v48 = vpop.eup %3291  ;;  %3297 = vrcp.f32 %v1769_v47 }
 0x51b   :  { %v1783_v50 = vmul.f32 %v3292_v48, %v3670_v34  ;;  %3299 = vrcp.f32 %v1772_v53 }
 0x51d   :  { %3176 = vmatmul.mubr.msk.f32.vlgmr.msra.gmra.mxu0 %vm1093_vm2, %v1783_v50 }
 0x51e   :  { %v3294_v51 = vpop.eup %3293  ;;  %3184 = vmatpush3.msra.mxu0 %v1023_v26  ;;  %3185 = vmatprep.mubr.msk.f32.mxu0 %vm3409_vm1, %v3408_v44 }
 0x51f   :  { %v1785_v42 = vmul.f32 %v3294_v51, %v3678_v49  ;;  %3193 = vmatprep.subr.mxu0 %v3408_v44 }
 0x520   :  { %v3296_v45 = vpop.eup %3295 }
 0x521   :  { %3181 = vmatmul.mubr.msk.f32.vlgmr.msra.gmra.mxu1 %vm1093_vm2, %v1785_v42  ;;  %v1787_v52 = vmul.f32 %v3296_v45, %v3680_v54 }
 0x522   :  { %3189 = vmatpush3.msra.mxu1 %v1024_v27  ;;  %3190 = vmatprep.mubr.msk.f32.mxu1 %vm3409_vm1, %v3408_v44 }
 0x523   :  { %3186 = vmatmul.mubr.msk.f32.vlgmr.msra.gmra.mxu0 %vm1093_vm2, %v1787_v52  ;;  %3198 = vmatprep.subr.mxu1 %v3408_v44 }
 0x524   :  { %3195 = vmatprep.mubr.msk.f32.mxu0 %vm3409_vm1, %v3408_v44 }
 0x527   :  { %v3298_v34 = vpop.eup %3297 }
 0x528   :  { %v1789_v49 = vmul.f32 %v3298_v34, %v3698_v39  ;;  %v3300_v29 = vpop.eup %3299 }
 0x52a   :  { %3191 = vmatmul.mubr.msk.f32.vlgmr.msra.gmra.mxu1 %vm1093_vm2, %v1789_v49 }
 0x52b   :  { %3200 = vmatprep.mubr.msk.f32.mxu1 %vm3409_vm1, %v3408_v44 }
 0x54d   :  { %v1775_v54 = vpop.xlane.xlu1 %1774 }
 0x54e   :  { %v1778_v56 = vpop.xlane.xlu0 %1777  ;;  %3301 = vrcp.f32 %v1775_v54 }
 0x54f   :  { %3303 = vrcp.f32 %v1778_v56 }
 0x551   :  { %v1781_v57 = vpop.xlane.xlu1 %1780 }
 0x552   :  { %v808_v58 = vpop.permute.xlu0 %807  ;;  %3305 = vrcp.f32 %v1781_v57 }
 0x553   :  { %v889_v59 = vcombine.low %v800_v35, %v808_v58  ;;  %v890_v62 = vcombine.high %v800_v35, %v808_v58  ;;  %v1791_v35 = vmul.f32 %v3300_v29, %v3690_v5 }
 0x555   :  { %v812_v0 = vpop.permute.xlu1 %811  ;;  %v897_v3 = vrot.slane %v889_v59, %v3497_v55  ;;  %v904_v4 = vrot.slane %v890_v62, %v3497_v55 }
 0x556   :  { %v905_v1 = vcombine.low %v804_v6, %v812_v0  ;;  %v906_v2 = vcombine.high %v804_v6, %v812_v0 }
 0x558   :  { %v913_v8 = vrot.slane %v905_v1, %v3497_v55  ;;  %v920_v9 = vrot.slane %v906_v2, %v3497_v55 }
 0x55a   :  { %v921_v10 = vcombine.low %v897_v3, %v913_v8  ;;  %v922_v11 = vcombine.high %v897_v3, %v913_v8  ;;  %v937_v12 = vcombine.low %v904_v4, %v920_v9  ;;  %v938_v13 = vcombine.high %v904_v4, %v920_v9 }
 0x55b   :  { %v3302_v43 = vpop.eup %3301 }
 0x55c   :  { %v929_v14 = vrot.slane %v921_v10, %v3507_v63  ;;  %v936_v18 = vrot.slane %v922_v11, %v3507_v63  ;;  %v945_v40 = vrot.slane %v937_v12, %v3507_v63  ;;  %v952_v39 = vrot.slane %v938_v13, %v3507_v63  ;;  %v3304_v33 = vpop.eup %3303 }
 0x55d   :  { %v1793_v6 = vmul.f32 %v3302_v43, %v3711_v22  ;;  %v1795_v47 = vmul.f32 %v3304_v33, %v3713_v32 }
 0x55e   :  { %v1025_v37 = vcombine.low %v929_v14, %v936_v18  ;;  %v3021_v41 = vcombine.high %v929_v14, %v936_v18  ;;  %v1041_v19 = vcombine.low %v945_v40, %v952_v39  ;;  %v3022_v20 = vcombine.high %v945_v40, %v952_v39 }
 0x55f   :  { %v3306_v7 = vpop.eup %3305 }
 0x560   :  { %v1032_v23 = vrot.slane %v1025_v37, %v3497_v55  ;;  %v1040_v24 = vrot.slane %v3021_v41, %v3497_v55  ;;  %v1048_v25 = vrot.slane %v1041_v19, %v3497_v55  ;;  %v1056_v26 = vrot.slane %v3022_v20, %v3497_v55 }
 0x561   :  { %v1797_v5 = vmul.f32 %v3306_v7, %v3719_v16 }
 0x562   :  { %v1057_v27 = vcombine.low %v1032_v23, %v1040_v24  ;;  %v1073_v28 = vcombine.low %v1048_v25, %v1056_v26  ;;  %v1058_v60 = vcombine.high %v1032_v23, %v1040_v24  ;;  %v1074_v61 = vcombine.high %v1048_v25, %v1056_v26 }
 0x564   :  { %v1065_v30 = vrot.slane %v1057_v27, %v3507_v63  ;;  %v1081_v38 = vrot.slane %v1073_v28, %v3507_v63  ;;  %v1072_v31 = vrot.slane %v1058_v60, %v3507_v63  ;;  %v1088_v21 = vrot.slane %v1074_v61, %v3507_v63 }
 0x566   :  { %v1089_v15 = vcombine.low %v1065_v30, %v1081_v38  ;;  %v1090_v17 = vcombine.high %v1065_v30, %v1081_v38  ;;  %v1091_v36 = vcombine.low %v1072_v31, %v1088_v21  ;;  %v1092_v46 = vcombine.high %v1072_v31, %v1088_v21 }
 0x568   :  { %3194 = vmatpush3.msra.mxu0 %v1089_v15  ;;  %3199 = vmatpush3.msra.mxu1 %v1090_v17 }
 0x569   :  { %3196 = vmatmul.mubr.msk.f32.vlgmr.msra.gmra.mxu0 %vm1093_vm2, %v1791_v35  ;;  %3201 = vmatmul.mubr.msk.f32.vlgmr.msra.gmra.mxu1 %vm1093_vm2, %v1793_v6 }
 0x56a   :  { %3203 = vmatprep.subr.mxu0 %v3408_v44  ;;  %3208 = vmatprep.subr.mxu1 %v3408_v44 }
 0x56b   :  { %3204 = vmatpush3.msra.mxu0 %v1091_v36  ;;  %3209 = vmatpush3.msra.mxu1 %v1092_v46 }
 0x56c   :  { %3205 = vmatprep.mubr.msk.f32.mxu0 %vm3409_vm1, %v3408_v44  ;;  %3210 = vmatprep.mubr.msk.f32.mxu1 %vm3409_vm1, %v3408_v44 }
 0x56d   :  { %3206 = vmatmul.mubr.msk.f32.vlgmr.msra.gmra.mxu0 %vm1093_vm2, %v1795_v47  ;;  %3211 = vmatmul.mubr.msk.f32.vlgmr.msra.gmra.mxu1 %vm1093_vm2, %v1797_v5 }
 0x5dd   :  { %v1867_v22 = vpop.f32.mrf.mxu0 }
 0x5df   :  { %v3177_v48 = vpop.f32.mrf.mxu0 }
 0x5e1   :  { %v1940_v50 = vpop.f32.mrf.mxu1 }
 0x5e3   :  { %v2013_v51 = vpop.f32.mrf.mxu0  ;;  %v3182_v42 = vpop.f32.mrf.mxu1 }
 0x5e4   :  { %v2382_v52 = vcombine.low %v1867_v22, %v2013_v51  ;;  %v2383_v32 = vcombine.high %v1867_v22, %v2013_v51  ;;  %v70_v51 = vld [vmem:[#allocation5 + $0x30] sm:$0xff] }
 0x5e5   :  { %v3187_v45 = vpop.f32.mrf.mxu0 }
 0x5e6   :  { %v2390_v54 = vrot.slane %v2382_v52, %v3497_v55  ;;  %v2397_v44 = vrot.slane %v2383_v32, %v3497_v55 }
 0x5ea   :  { %v2086_v34 = vpop.f32.mrf.mxu1 }
 0x5eb   :  { %v2398_v16 = vcombine.low %v1940_v50, %v2086_v34  ;;  %v2399_v49 = vcombine.high %v1940_v50, %v2086_v34  ;;  %v71_v50 = vld [vmem:[#allocation5 + $0x38] sm:$0xff] }
 0x5ec   :  { %v3192_v53 = vpop.f32.mrf.mxu1  ;;  %3213 = vmatprep.subr.mxu0 %v71_v50 }
 0x5ed   :  { %v2406_v56 = vrot.slane %v2398_v16, %v3497_v55  ;;  %v2413_v57 = vrot.slane %v2399_v49, %v3497_v55  ;;  %3214 = vmatpush3.msra.mxu0 %v71_v50  ;;  %v72_v50 = vld [vmem:[#allocation5 + $0x40] sm:$0xff] }
 0x5ee   :  { %3215 = vmatprep.subr.mxu0 %v70_v51 }
 0x5ef   :  { %v2414_v58 = vcombine.low %v2390_v54, %v2406_v56  ;;  %v2415_v59 = vcombine.high %v2390_v54, %v2406_v56  ;;  %v2430_v62 = vcombine.low %v2397_v44, %v2413_v57  ;;  %v2431_v0 = vcombine.high %v2397_v44, %v2413_v57  ;;  %3216 = vmatpush3.msra.mxu0 %v70_v51  ;;  %v69_v54 = vld [vmem:[#allocation5 + $0x28] sm:$0xff]  ;;  %v68_v44 = vld [vmem:[#allocation5 + $0x20] sm:$0xff]  ;;  %v83_v51 = vld [vmem:[#allocation5 + $0x98] sm:$0xff] }
 0x5f0   :  { %3217 = vmatprep.subr.mxu0 %v69_v54 }
 0x5f1   :  { %v2422_v1 = vrot.slane %v2414_v58, %v3507_v63  ;;  %v2429_v2 = vrot.slane %v2415_v59, %v3507_v63  ;;  %v2438_v3 = vrot.slane %v2430_v62, %v3507_v63  ;;  %v2445_v4 = vrot.slane %v2431_v0, %v3507_v63  ;;  %3218 = vmatpush3.msra.mxu0 %v69_v54 }
 0x5f2   :  { %3219 = vmatprep.subr.mxu0 %v68_v44 }
 0x5f3   :  { %v2518_v8 = vcombine.low %v2422_v1, %v2429_v2  ;;  %v3047_v9 = vcombine.high %v2422_v1, %v2429_v2  ;;  %v2534_v10 = vcombine.low %v2438_v3, %v2445_v4  ;;  %v3048_v11 = vcombine.high %v2438_v3, %v2445_v4  ;;  %3220 = vmatpush3.msra.mxu0 %v68_v44 }
 0x5f4   :  { %3235 = vmatprep.subr.mxu0 %v83_v51 }
 0x5f5   :  { %v2525_v12 = vrot.slane %v2518_v8, %v3497_v55  ;;  %v2533_v13 = vrot.slane %v3047_v9, %v3497_v55  ;;  %v2541_v14 = vrot.slane %v2534_v10, %v3497_v55  ;;  %v2549_v18 = vrot.slane %v3048_v11, %v3497_v55 }
 0x5f7   :  { %v2550_v40 = vcombine.low %v2525_v12, %v2533_v13  ;;  %v2566_v39 = vcombine.low %v2541_v14, %v2549_v18  ;;  %v2551_v37 = vcombine.high %v2525_v12, %v2533_v13  ;;  %v2567_v41 = vcombine.high %v2541_v14, %v2549_v18 }
 0x5f9   :  { %v3788_v19 = vrot.slane %v2550_v40, %v3507_v63  ;;  %v3791_v20 = vrot.slane %v2566_v39, %v3507_v63  ;;  %v2565_v25 = vrot.slane %v2551_v37, %v3507_v63  ;;  %v2581_v26 = vrot.slane %v2567_v41, %v3507_v63 }
 0x5fb   :  { %v2583_v23 = vcombine.high %v3788_v19, %v3791_v20  ;;  %v2582_v24 = vcombine.low %v3788_v19, %v3791_v20  ;;  %v2584_v27 = vcombine.low %v2565_v25, %v2581_v26  ;;  %v2585_v28 = vcombine.high %v2565_v25, %v2581_v26  ;;  %v3311_v20 = vld [vmem:[#allocation2 + $0x8] sm:$0xff] }
 0x5fd   :  { %2656 = vrot.lane.b32.xlu0 %v2583_v23, %s3402_s18 }
 0x601   :  { %2664 = vrot.lane.b32.xlu0 %v2584_v27, %s3413_s4 }
 0x605   :  { %2672 = vrot.lane.b32.xlu0 %v2585_v28, %s3414_s5  ;;  %v3051_v28 = vld [vmem:[#allocation7 + $0x3] ss:$0 sm:$0xff] }
 0x629   :  { %v2159_v60 = vpop.f32.mrf.mxu0  ;;  %v2232_v61 = vpop.f32.mrf.mxu1 }
 0x62b   :  { %v3197_v29 = vpop.f32.mrf.mxu0  ;;  %v3202_v43 = vpop.f32.mrf.mxu1 }
 0x62c   :  { %v3312_v43 = vld [vmem:[#allocation2] sm:$0xff] }
 0x62d   :  { %v2305_v30 = vpop.f32.mrf.mxu0  ;;  %v2378_v38 = vpop.f32.mrf.mxu1 }
 0x62e   :  { %v2450_v31 = vcombine.low %v2159_v60, %v2305_v30  ;;  %v2451_v21 = vcombine.high %v2159_v60, %v2305_v30  ;;  %v2466_v33 = vcombine.low %v2232_v61, %v2378_v38  ;;  %v2467_v15 = vcombine.high %v2232_v61, %v2378_v38 }
 0x62f   :  { %v3207_v17 = vpop.f32.mrf.mxu0  ;;  %v3212_v35 = vpop.f32.mrf.mxu1 }
 0x630   :  { %v2458_v6 = vrot.slane %v2450_v31, %v3497_v55  ;;  %v2465_v7 = vrot.slane %v2451_v21, %v3497_v55  ;;  %v2474_v36 = vrot.slane %v2466_v33, %v3497_v55  ;;  %v2481_v46 = vrot.slane %v2467_v15, %v3497_v55 }
 0x632   :  { %v2482_v47 = vcombine.low %v2458_v6, %v2474_v36  ;;  %v2483_v5 = vcombine.high %v2458_v6, %v2474_v36  ;;  %v2498_v22 = vcombine.low %v2465_v7, %v2481_v46  ;;  %v2499_v48 = vcombine.high %v2465_v7, %v2481_v46 }
 0x634   :  { %v2490_v42 = vrot.slane %v2482_v47, %v3507_v63  ;;  %v2497_v45 = vrot.slane %v2483_v5, %v3507_v63  ;;  %v2506_v52 = vrot.slane %v2498_v22, %v3507_v63  ;;  %v2513_v32 = vrot.slane %v2499_v48, %v3507_v63  ;;  %v75_v5 = vld [vmem:[#allocation5 + $0x58] sm:$0xff]  ;;  %v74_v22 = vld [vmem:[#allocation5 + $0x50] sm:$0xff]  ;;  %v73_v48 = vld [vmem:[#allocation5 + $0x48] sm:$0xff] }
 0x635   :  { %3224 = vmatprep.subr.mxu1 %v75_v5 }
 0x636   :  { %v2586_v34 = vcombine.low %v2490_v42, %v2497_v45  ;;  %v3049_v16 = vcombine.high %v2490_v42, %v2497_v45  ;;  %v2602_v49 = vcombine.low %v2506_v52, %v2513_v32  ;;  %v3050_v53 = vcombine.high %v2506_v52, %v2513_v32  ;;  %3225 = vmatpush3.msra.mxu1 %v75_v5  ;;  %v82_v42 = vld [vmem:[#allocation5 + $0x90] sm:$0xff]  ;;  %v81_v45 = vld [vmem:[#allocation5 + $0x88] sm:$0xff]  ;;  %v80_v52 = vld [vmem:[#allocation5 + $0x80] sm:$0xff] }
 0x637   :  { %3226 = vmatprep.subr.mxu1 %v74_v22 }
 0x638   :  { %v2593_v56 = vrot.slane %v2586_v34, %v3497_v55  ;;  %v2601_v57 = vrot.slane %v3049_v16, %v3497_v55  ;;  %v2609_v58 = vrot.slane %v2602_v49, %v3497_v55  ;;  %v2617_v59 = vrot.slane %v3050_v53, %v3497_v55  ;;  %3227 = vmatpush3.msra.mxu1 %v74_v22 }
 0x639   :  { %3228 = vmatprep.subr.mxu1 %v73_v48 }
 0x63a   :  { %v2618_v62 = vcombine.low %v2593_v56, %v2601_v57  ;;  %v2634_v0 = vcombine.low %v2609_v58, %v2617_v59  ;;  %v2619_v1 = vcombine.high %v2593_v56, %v2601_v57  ;;  %v2635_v2 = vcombine.high %v2609_v58, %v2617_v59  ;;  %3229 = vmatpush3.msra.mxu1 %v73_v48  ;;  %v3054_v56 = vld [vmem:[#allocation7 + $0x4] ss:$0 sm:$0xff]  ;;  %v3055_v58 = vld [vmem:[#allocation7 + $0x5] ss:$0 sm:$0xff] }
 0x63b   :  { %3230 = vmatprep.subr.mxu1 %v72_v50 }
 0x63c   :  { %v2626_v3 = vrot.slane %v2618_v62, %v3507_v63  ;;  %v2642_v4 = vrot.slane %v2634_v0, %v3507_v63  ;;  %v2633_v10 = vrot.slane %v2619_v1, %v3507_v63  ;;  %v2649_v11 = vrot.slane %v2635_v2, %v3507_v63  ;;  %3231 = vmatpush3.msra.mxu1 %v72_v50 }
 0x63e   :  { %v2651_v8 = vcombine.high %v2626_v3, %v2642_v4  ;;  %v2650_v9 = vcombine.low %v2626_v3, %v2642_v4  ;;  %v2652_v55 = vcombine.low %v2633_v10, %v2649_v11  ;;  %v2653_v12 = vcombine.high %v2633_v10, %v2649_v11  ;;  %v79_v4 = vld [vmem:[#allocation5 + $0x78] sm:$0xff]  ;;  %v76_v10 = vld [vmem:[#allocation5 + $0x60] sm:$0xff] }
 0x63f   :  { %v3056_v11 = vld [vmem:[#allocation7 + $0x6] ss:$0 sm:$0xff] }
 0x640   :  { %2658 = vrot.lane.b32.xlu1 %v2651_v8, %s3402_s18  ;;  %v78_v8 = vld [vmem:[#allocation5 + $0x70] sm:$0xff] }
 0x644   :  { %2666 = vrot.lane.b32.xlu1 %v2652_v55, %s3413_s4 }
 0x648   :  { %2674 = vrot.lane.b32.xlu1 %v2653_v12, %s3414_s5 }
 0x66f   :  { %v2657_v13 = vpop.permute.xlu0 %2656 }
 0x670   :  { %v2678_v18 = vsel %vm1093_vm2, %v2582_v24, %v2657_v13 }
 0x673   :  { %v2665_v14 = vpop.permute.xlu0 %2664 }
 0x674   :  { %v2681_v40 = vsel %vm2680_vm3, %v2678_v18, %v2665_v14 }
 0x677   :  { %v2673_v39 = vpop.permute.xlu0 %2672 }
 0x678   :  { %v2684_v63 = vsel %vm2683_vm4, %v2681_v40, %v2673_v39  ;;  %v3059_v39 = vld [vmem:[#allocation7 + $0x7] ss:$0 sm:$0xff] }
 0x679   :  { %3221 = vmatprep.mubr.msk.f32.mxu0 %vm84_vm0, %v2684_v63 }
 0x6b2   :  { %v2659_v37 = vpop.permute.xlu1 %2658 }
 0x6b3   :  { %v2679_v23 = vsel %vm1093_vm2, %v2650_v9, %v2659_v37  ;;  %v77_v9 = vld [vmem:[#allocation5 + $0x68] sm:$0xff] }
 0x6b6   :  { %v2667_v41 = vpop.permute.xlu1 %2666 }
 0x6b7   :  { %v2682_v25 = vsel %vm2680_vm3, %v2679_v23, %v2667_v41 }
 0x6ba   :  { %v2675_v26 = vpop.permute.xlu1 %2674 }
 0x6bb   :  { %v2685_v27 = vsel %vm2683_vm4, %v2682_v25, %v2675_v26 }
 0x6bc   :  { %3222 = vmatmul.mubr.msk.f32.vlgmr.msra.gmra.mxu0 %vm84_vm0, %v2685_v27 }
 0x6bd   :  { %3236 = vmatpush3.msra.mxu0 %v83_v51 }
 0x6be   :  { %3237 = vmatprep.subr.mxu0 %v82_v42 }
 0x6bf   :  { %3238 = vmatpush3.msra.mxu0 %v82_v42 }
 0x6c0   :  { %3239 = vmatprep.subr.mxu0 %v81_v45 }
 0x6c1   :  { %3240 = vmatpush3.msra.mxu0 %v81_v45 }
 0x6c2   :  { %3241 = vmatprep.subr.mxu0 %v80_v52 }
 0x6c3   :  { %3242 = vmatpush3.msra.mxu0 %v80_v52 }
 0x6c4   :  { %3243 = vmatprep.subr.mxu0 %v79_v4 }
 0x6c5   :  { %3244 = vmatpush3.msra.mxu0 %v79_v4 }
 0x6c6   :  { %3245 = vmatprep.subr.mxu0 %v78_v8 }
 0x6c7   :  { %3246 = vmatpush3.msra.mxu0 %v78_v8 }
 0x6c8   :  { %3247 = vmatprep.subr.mxu0 %v77_v9 }
 0x6c9   :  { %3248 = vmatpush3.msra.mxu0 %v77_v9 }
 0x6ca   :  { %3249 = vmatprep.subr.mxu0 %v76_v10 }
 0x6cb   :  { %3250 = vmatpush3.msra.mxu0 %v76_v10 }
 0x77c   :  { %v3223_v60 = vpop.f32.mrf.mxu0 }
 0x77d   :  { %v2768_v61 = vadd.f32 %v3223_v60, %v3051_v28 }
 0x77e   :  { %v2762_v19 = vpop.f32.mrf.mxu0 }
 0x77f   :  { %v3828_v24 = vadd.f32 %v3311_v20, %v2768_v61  ;;  %v2763_v29 = vadd.f32 %v3051_v28, %v2762_v19 }
 0x781   :  { %v3830_v30 = vadd.f32 %v3312_v43, %v2763_v29  ;;  %v2776_v38 = vsel %vm84_vm0, %v3828_v24, 0.0 }
 0x782   :  { %2777 = vadd.xlane.f32.xlu1 %v2776_v38 }
 0x783   :  { %v2773_v31 = vsel %vm84_vm0, %v3830_v30, 0.0 }
 0x784   :  { %2774 = vadd.xlane.f32.xlu0 %v2773_v31 }
 0x80b   :  { %v2778_v21 = vpop.xlane.xlu1 %2777 }
 0x80c   :  { %v2780_v33 = vmul.f32 0.03125, %v2778_v21 }
 0x80d   :  { %v2775_v15 = vpop.xlane.xlu0 %2774 }
 0x80e   :  { %v2779_v17 = vmul.f32 0.03125, %v2775_v15  ;;  %v2782_v35 = vsub.f32 %v3828_v24, %v2780_v33 }
 0x810   :  { %v2781_v6 = vsub.f32 %v3830_v30, %v2779_v17  ;;  %v2784_v46 = vmul.f32 %v2782_v35, %v2782_v35 }
 0x812   :  { %v2783_v7 = vmul.f32 %v2781_v6, %v2781_v6  ;;  %v2788_v47 = vsel %vm84_vm0, %v2784_v46, 0.0 }
 0x814   :  { %v2785_v36 = vsel %vm84_vm0, %v2783_v7, 0.0 }
 0x815   :  { %2786 = vadd.xlane.f32.xlu0 %v2785_v36 }
 0x819   :  { %2789 = vadd.xlane.f32.xlu0 %v2788_v47 }
 0x89e   :  { %v2787_v32 = vpop.xlane.xlu0 %2786 }
 0x89f   :  { %v2791_v34 = vmul.f32 0.03125, %v2787_v32 }
 0x8a1   :  { %v2793_v16 = vadd.f32 1e-05, %v2791_v34 }
 0x8a2   :  { %v2790_v49 = vpop.xlane.xlu0 %2789 }
 0x8a3   :  { %3307 = vrsqrt.f32 %v2793_v16  ;;  %v2792_v53 = vmul.f32 0.03125, %v2790_v49 }
 0x8a5   :  { %v2794_v54 = vadd.f32 1e-05, %v2792_v53 }
 0x8a7   :  { %3309 = vrsqrt.f32 %v2794_v54 }
 0x8b0   :  { %v3308_v44 = vpop.eup %3307 }
 0x8b1   :  { %v2797_v57 = vmul.f32 %v3308_v44, %v2781_v6 }
 0x8b3   :  { %v2803_v59 = vmul.f32 %v3054_v56, %v2797_v57 }
 0x8b4   :  { %v3310_v62 = vpop.eup %3309 }
 0x8b5   :  { %v2798_v0 = vmul.f32 %v3310_v62, %v2782_v35  ;;  %v2809_v1 = vadd.f32 %v3055_v58, %v2803_v59 }
 0x8b7   :  { %v2804_v2 = vmul.f32 %v3054_v56, %v2798_v0  ;;  %3232 = vmatprep.mubr.msk.f32.mxu1 %vm84_vm0, %v2809_v1 }
 0x8b9   :  { %v2810_v3 = vadd.f32 %v3055_v58, %v2804_v2 }
 0x8bb   :  { %3233 = vmatmul.mubr.msk.f32.vlgmr.msra.gmra.mxu1 %vm84_vm0, %v2810_v3 }
 0x97b   :  { %v3234_v55 = vpop.f32.mrf.mxu1 }
 0x97c   :  { %v2893_v12 = vadd.f32 %v3234_v55, %v3056_v11 }
 0x97d   :  { %v2887_v13 = vpop.f32.mrf.mxu1 }
 0x97e   :  { %v2888_v14 = vadd.f32 %v3056_v11, %v2887_v13  ;;  %v2897_v40 = vmax.f32 %v2893_v12, 0.0 }
 0x980   :  { %v2896_v18 = vmax.f32 %v2888_v14, 0.0 }
 0x982   :  { %3251 = vmatprep.mubr.msk.f32.mxu0 %vm2902_vm5, %v2896_v18 }
 0x983   :  { %3252 = vmatmul.mubr.msk.f32.vlgmr.msra.gmra.mxu0 %vm2902_vm5, %v2897_v40 }
 0xa43   :  { %v3253_v63 = vpop.f32.mrf.mxu0 }
 0xa44   :  { %v2981_v37 = vadd.f32 %v3253_v63, %v3059_v39 }
 0xa45   :  { %v2975_v41 = vpop.f32.mrf.mxu0 }
 0xa46   :  { %v2985_v23 = vadd.f32 %v2981_v37, %v3828_v24  ;;  %v2976_v25 = vadd.f32 %v3059_v39, %v2975_v41 }
 0xa48   :  { %2987 = vst.msk [vmem:[#allocation8 + $0x8] sm:$0xff] %vm84_vm0, %v2985_v23  ;;  %v2984_v26 = vadd.f32 %v2976_v25, %v3830_v30 }
 0xa4a   :  { %2986 = vst.msk [vmem:[#allocation8] sm:$0xff] %vm84_vm0, %v2984_v26 }
 0xa4b   :  { %3384 = shalt.err (!%p3381_p5)
}
 0xa4c   :  { %2999 = dma.vmem_to_hbm [thread:$0]  %s2994_s7, 256, %s3855_s3, [#allocation4], %s3401_s17, %s3401_s17, %s3402_s18  }
 0xa4d   :  { %3397 = dma.done.wait [#allocation4], 256  }
 0xa4e   :  { %3398 = vsyncadd [#allocation4], 4294967040 }
 0xa4f   :  { %3003 = vsyncpa [#allocation3], 1 }
 0xa50   :  { %3004 = vsyncpa [#allocation6], 1 }
 0xa51   :  { %3005 = vsyncpa [#allocation4], 1 }

</bundles_post_ra>
